<compile_context>
chip_gen: v7x
topology: tpu7x:2x2x1
jax: 0.10.0
libtpu: 0.0.40
codegen_flags: <defaults>
</compile_context>

<pallas_src>
import functools

import jax
import jax.numpy as jnp
from jax.experimental import pallas as pl
from jax.experimental.pallas import tpu as pltpu


def _router_kernel(x_ref, wg_ref, bias_ref, s_out_ref, mask_out_ref, acc_ref,
                   *, N, K, Ks):
    """One (tm, tk) x-tile x (tk, N) Wg-tile step of the router.

    Grid is (token_tiles, d_tiles); the D axis is an "arbitrary" reduction axis.
    acc_ref (tm, N) f32 holds the running x @ Wg partial sum; the softmax /
    top-k / normalization run once, on the last D step, and write the (N, tm)
    lane-dense outputs directly in the final (N, M) return layout.
    """
    k = pl.program_id(1)

    @pl.when(k == 0)
    def _init():
        acc_ref[...] = jnp.zeros_like(acc_ref)

    # Canonical NN MXU matmul: contract x's minor dim with Wg's major dim, so
    # the big x tile is fed to the MXU without any transpose.
    x = x_ref[...].astype(jnp.bfloat16)          # cast on the VPU, not in XLA
    acc_ref[...] += jnp.dot(x, wg_ref[...], preferred_element_type=jnp.float32)

    @pl.when(k == pl.num_programs(1) - 1)
    def _finalize():
        Ng = N - Ks                              # routed (gated) experts
        Kg = K - Ks                              # routed experts chosen per token
        neg_inf = jnp.float32(-jnp.inf)

        # torch does the matmul fully in bf16 -> round the f32 accumulator once.
        s_raw_tn = acc_ref[...].astype(jnp.bfloat16).astype(jnp.float32)
        # Only the small (tm, N) result is transposed (~N*tm/1024 vregs), giving
        # token-on-lanes (N, tm) orientation for everything downstream.
        s_raw = jnp.transpose(s_raw_tn)          # (N, tm) f32

        row = jax.lax.broadcasted_iota(jnp.int32, (N, 1), 0)      # (N, 1)
        routed = row < Ng                                          # (N, 1) bool

        # ---- fused segmented softmax (single exp pass over the tile) ----
        if Ng > 0 and Ks > 0:
            m_r = jnp.max(jnp.where(routed, s_raw, neg_inf), axis=0, keepdims=True)
            m_s = jnp.max(jnp.where(routed, neg_inf, s_raw), axis=0, keepdims=True)
            m = jnp.where(routed, m_r, m_s)
        else:                                    # only one segment exists
            m = jnp.max(s_raw, axis=0, keepdims=True)
        e = jnp.exp(s_raw - m)
        d_all = jnp.sum(e, axis=0, keepdims=True)
        if Ng > 0 and Ks > 0:
            d_r = jnp.sum(jnp.where(routed, e, 0.0), axis=0, keepdims=True)
            d_s = d_all - d_r
            inv_d = jnp.where(routed, 1.0 / d_r, 1.0 / d_s)        # exact recip
        else:
            inv_d = 1.0 / d_all
        s_post = e * inv_d                        # segmented softmax, (N, tm)

        # ---- top-(K-Ks) over routed experts of (softmax + bias) ----
        # bias only steers the selection; the kept weights are the raw softmax.
        if Kg > 0 and Ng > 0:
            rowf = row.astype(jnp.float32)                          # (N, 1)
            avail = jnp.where(routed, s_post + bias_ref[...], neg_inf)
            for _ in range(Kg):
                mx = jnp.max(avail, axis=0, keepdims=True)
                # first-occurrence argmax along experts (torch.topk tie order)
                first = jnp.min(jnp.where(avail == mx, rowf, jnp.float32(N)),
                                axis=0, keepdims=True)
                avail = jnp.where(rowf == first, neg_inf, avail)    # knock out
            # selected routed experts are exactly the knocked-out entries
            sel = jnp.logical_and(routed, avail == neg_inf)         # (N, tm)
            ng_sum = jnp.sum(jnp.where(sel, s_post, 0.0), axis=0, keepdims=True)
            ng_inv = 1.0 / ng_sum
        else:
            # Kg == 0 (or no routed experts): routed weights are all zero; use
            # a unit reciprocal to avoid 0/0 NaNs.
            sel = jnp.zeros(s_post.shape, dtype=jnp.bool_)
            ng_inv = jnp.ones((1, s_post.shape[1]), dtype=jnp.float32)
        if Ks > 0:
            ks_sum = jnp.sum(jnp.where(routed, 0.0, s_post), axis=0, keepdims=True)
            ks_inv = 1.0 / ks_sum
        else:
            ks_inv = jnp.ones((1, s_post.shape[1]), dtype=jnp.float32)

        keep = jnp.logical_or(sel, jnp.logical_not(routed))   # shared always kept
        inv_norm = jnp.where(routed, ng_inv, ks_inv)
        s_out_ref[...] = jnp.where(keep, s_post * inv_norm, 0.0)   # lane-dense store
        mask_out_ref[...] = keep.astype(mask_out_ref.dtype)


def _round_up_128(v):
    return ((v + 127) // 128) * 128


def _pick_tiles(M, D, x_itemsize, vmem_cap_bytes):
    """Pick (tm, tk, vmem_ceiling) given the chip's per-core VMEM capacity."""
    small_vmem = vmem_cap_bytes <= 64 * 1024 * 1024   # v7x: 64 MiB/TC, 2 TCs
    if small_vmem:
        x_budget = 18 * 1024 * 1024
        vmem_ceiling = 48 * 1024 * 1024
    else:                                             # v5e / v6e: 128 MiB
        x_budget = 56 * 1024 * 1024
        vmem_ceiling = 100 * 1024 * 1024

    # ---- token tile (lanes of the output) ----
    if M <= 256:
        tm = M                                        # single small block
    else:
        tm = 512
        if small_vmem:
            # 2 TensorCores split the "parallel" grid axis: keep >= 2 token
            # tiles so both cores get work.
            tm = min(tm, _round_up_128(pl.cdiv(M, 2)))
        tm = min(tm, _round_up_128(M))

    # ---- contraction (D) tile ----
    tk = D
    if 2 * tm * D * x_itemsize > x_budget:
        # Keep the token tile lane-dense and split D instead: largest
        # 128-multiple divisor of D whose double-buffered x tile fits.
        cand = int((x_budget // (2 * tm * x_itemsize)) // 128 * 128)
        best = None
        c = cand
        while c >= 128:
            if D % c == 0:
                best = c
                break
            c -= 128
        if best is not None:
            tk = best
        else:
            # No friendly divisor of D: fall back to shrinking the token tile.
            while tm > 128 and 2 * tm * D * x_itemsize > x_budget:
                tm //= 2
            tk = D
    return tm, tk, vmem_ceiling


def topk_router_forward(x_BSD, Wg_DN, biases_N, *, N, K, Ks,
                        tm=None, tk=None, mask_dtype=jnp.int32):
    """Returns (x_BSD, mask_NM, s_NM) matching TopKRouterFunction.forward.

    Pass mask_dtype=jnp.int8 if the consumer accepts it (4x less mask HBM
    writeback); the default int32 matches the PyTorch contract.
    If activations already exist as bf16 upstream, pass them as bf16 (halves
    the dominant HBM read); do not add a standalone cast just for the router.
    """
    B, S, D = x_BSD.shape
    M = B * S
    x_MD = x_BSD.reshape(M, D)                 # keep dtype; bf16 cast happens in-kernel
    Wg_bf16 = Wg_DN.astype(jnp.bfloat16)       # no-op when already bf16 (torch contract)
    bias_N1 = biases_N.astype(jnp.float32).reshape(N, 1)

    try:
        vmem_cap = pltpu.get_tpu_info().vmem_capacity_bytes
    except Exception:                          # conservative default (fits every gen)
        vmem_cap = 64 * 1024 * 1024
    tm_auto, tk_auto, vmem_ceiling = _pick_tiles(M, D, x_MD.dtype.itemsize, vmem_cap)
    if tm is None:
        tm = tm_auto
    if tk is None:
        tk = tk_auto

    grid = (pl.cdiv(M, tm), pl.cdiv(D, tk))    # ragged M handled by boundary padding

    mask_bytes = jnp.dtype(mask_dtype).itemsize
    est = (2 * tm * tk * x_MD.dtype.itemsize          # x tile, double-buffered
           + 2 * tk * N * 2                           # Wg tile (bf16)
           + 2 * N * 4                                # bias
           + 2 * N * tm * (4 + mask_bytes)            # outputs, double-buffered
           + tm * N * 4)                              # accumulator scratch
    vmem_limit = int(min(max(2 * est, 32 * 1024 * 1024), vmem_ceiling))

    kernel = functools.partial(_router_kernel, N=N, K=K, Ks=Ks)
    s_NM, mask_NM = pl.pallas_call(
        kernel,
        grid=grid,
        in_specs=[
            pl.BlockSpec((tm, tk), lambda i, k: (i, k)),   # token x D tile
            pl.BlockSpec((tk, N), lambda i, k: (k, 0)),    # gating weight tile
            pl.BlockSpec((N, 1), lambda i, k: (0, 0)),     # per-expert bias column
        ],
        out_specs=[
            pl.BlockSpec((N, tm), lambda i, k: (0, i)),    # scores, (N, M) layout
            pl.BlockSpec((N, tm), lambda i, k: (0, i)),    # mask,   (N, M) layout
        ],
        out_shape=[
            jax.ShapeDtypeStruct((N, M), jnp.float32),
            jax.ShapeDtypeStruct((N, M), mask_dtype),
        ],
        scratch_shapes=[pltpu.VMEM((tm, N), jnp.float32)],
        compiler_params=pltpu.CompilerParams(
            dimension_semantics=("parallel", "arbitrary"),
            vmem_limit_bytes=vmem_limit),
        cost_estimate=pl.CostEstimate(
            flops=2 * M * D * N,
            transcendentals=M * N,
            bytes_accessed=(M * D * x_MD.dtype.itemsize + D * N * 2
                            + M * N * (4 + mask_bytes))),
    )(x_MD, Wg_bf16, bias_N1)

    # x is returned unchanged (routing only produces mask/scores); outputs are
    # already in the PyTorch (N, M) layout — no host-side transpose needed.
    # TODO(synk): backward pass (normalize_backward + grad matmuls) not implemented here.
    return x_BSD, mask_NM, s_NM


if __name__ == "__main__":
    # Small, deterministic setup consistent with the module's forward.
    B, S, D = 2, 8, 32
    N, K, Ks = 8, 4, 2          # 8 experts, 4 chosen total, 2 shared
    key = jax.random.PRNGKey(0)
    kx, kw, kb = jax.random.split(key, 3)

    x_BSD = jax.random.normal(kx, (B, S, D), dtype=jnp.float32)
    # Wg_DN init matches nn.Parameter(torch.randn(D, N) / D) in bf16.
    Wg_DN = (jax.random.normal(kw, (D, N), dtype=jnp.float32) / D).astype(jnp.bfloat16)
    biases_N = 0.1 * jax.random.normal(kb, (N,), dtype=jnp.float32)

    x_out, mask_NM, s_NM = topk_router_forward(x_BSD, Wg_DN, biases_N, N=N, K=K, Ks=Ks)
    jax.block_until_ready((x_out, mask_NM, s_NM))

    # Sanity checks on shapes, dtypes and normalization/selection structure.
    M = B * S
    assert x_out.shape == (B, S, D)
    assert mask_NM.shape == (N, M) and mask_NM.dtype == jnp.int32
    assert s_NM.shape == (N, M) and s_NM.dtype == jnp.float32
    assert bool(jnp.all(jnp.isfinite(s_NM)))
    # routed part sums to 1 per token, shared part sums to 1 per token
    routed_sum = s_NM[: N - Ks].sum(axis=0)
    shared_sum = s_NM[N - Ks:].sum(axis=0)
    assert jnp.allclose(routed_sum, 1.0, atol=1e-5)
    assert jnp.allclose(shared_sum, 1.0, atol=1e-5)
    # exactly K-Ks routed experts selected per token; shared mask rows are all 1
    assert jnp.all(mask_NM[: N - Ks].sum(axis=0) == (K - Ks))
    assert jnp.all(mask_NM[N - Ks:] == 1)
    # routed score mass lands only on selected experts
    assert bool(jnp.all((s_NM[: N - Ks] > 0) == (mask_NM[: N - Ks] == 1)))

    print("KERNEL_OK")
</pallas_src>

<mosaic_0001>
module attributes {stable_mosaic.version = 11 : i64} {
  func.func @_router_kernel(%arg0: i32, %arg1: i32, %arg2: memref<16x32xf32, #tpu.memory_space<vmem>>, %arg3: memref<32x8xbf16, #tpu.memory_space<vmem>>, %arg4: memref<8x1xf32, #tpu.memory_space<vmem>>, %arg5: memref<8x16xf32, #tpu.memory_space<vmem>>, %arg6: memref<8x16xi32, #tpu.memory_space<vmem>>, %arg7: memref<16x8xf32, #tpu.memory_space<vmem>>) attributes {dimension_semantics = [#tpu.dimension_semantics<parallel>, #tpu.dimension_semantics<arbitrary>], iteration_bounds = array<i64: 1, 1>, scalar_prefetch = 0 : i64, scratch_operands = 1 : i64, tpu.core_type = #tpu.core_type<tc>, window_params = [{transform_indices = @transform_0, window_bounds = array<i64: 16, 32>}, {transform_indices = @transform_1, window_bounds = array<i64: 32, 8>}, {pipeline_mode = #tpu.pipeline_mode<synchronous>, transform_indices = @transform_2, window_bounds = array<i64: 8, 1>}, {transform_indices = @transform_3, window_bounds = array<i64: 8, 16>}, {transform_indices = @transform_4, window_bounds = array<i64: 8, 16>}]} {
    %c0_i32 = arith.constant 0 : i32
    %0 = arith.cmpi eq, %arg1, %c0_i32 : i32
    %1 = arith.extui %0 : i1 to i32
    %c0_i32_0 = arith.constant 0 : i32
    %2 = arith.cmpi ne, %1, %c0_i32_0 : i32
    scf.if %2 {
      %cst_10 = arith.constant 0.000000e+00 : f32
      %13 = vector.broadcast %cst_10 : f32 to vector<16x8xf32>
      %c0_11 = arith.constant 0 : index
      %c0_12 = arith.constant 0 : index
      %14 = vector.load %arg7[%c0_11, %c0_12] : memref<16x8xf32, #tpu.memory_space<vmem>>, vector<16x8xf32>
      tpu.vector_store %arg7[%c0_11, %c0_12], %13 {strides = array<i32>} : memref<16x8xf32, #tpu.memory_space<vmem>>, vector<16x8xf32>,
    } else {
    }
    %c0 = arith.constant 0 : index
    %c0_1 = arith.constant 0 : index
    %3 = vector.load %arg2[%c0, %c0_1] : memref<16x32xf32, #tpu.memory_space<vmem>>, vector<16x32xf32>
    %4 = arith.truncf %3 : vector<16x32xf32> to vector<16x32xbf16>
    %c0_2 = arith.constant 0 : index
    %c0_3 = arith.constant 0 : index
    %5 = vector.load %arg7[%c0_2, %c0_3] : memref<16x8xf32, #tpu.memory_space<vmem>>, vector<16x8xf32>
    %c0_4 = arith.constant 0 : index
    %c0_5 = arith.constant 0 : index
    %6 = vector.load %arg3[%c0_4, %c0_5] : memref<32x8xbf16, #tpu.memory_space<vmem>>, vector<32x8xbf16>
    %cst = arith.constant dense<0.000000e+00> : vector<16x8xf32>
    %7 = tpu.matmul %4, %6, %cst {dimension_numbers = #tpu.dot_dimension_numbers<[1], [0], [0], [1], [0, 0, 1, 1], [], []>} : vector<16x32xbf16>, vector<32x8xbf16>, vector<16x8xf32> -> vector<16x8xf32>
    %8 = arith.addf %5, %7 : vector<16x8xf32>
    %c0_6 = arith.constant 0 : index
    %c0_7 = arith.constant 0 : index
    %9 = vector.load %arg7[%c0_6, %c0_7] : memref<16x8xf32, #tpu.memory_space<vmem>>, vector<16x8xf32>
    tpu.vector_store %arg7[%c0_6, %c0_7], %8 {strides = array<i32>} : memref<16x8xf32, #tpu.memory_space<vmem>>, vector<16x8xf32>,
    %c0_i32_8 = arith.constant 0 : i32
    %10 = arith.cmpi eq, %arg1, %c0_i32_8 : i32
    %11 = arith.extui %10 : i1 to i32
    %c0_i32_9 = arith.constant 0 : i32
    %12 = arith.cmpi ne, %11, %c0_i32_9 : i32
    scf.if %12 {
      %c0_10 = arith.constant 0 : index
      %c0_11 = arith.constant 0 : index
      %13 = vector.load %arg7[%c0_10, %c0_11] : memref<16x8xf32, #tpu.memory_space<vmem>>, vector<16x8xf32>
      %14 = arith.truncf %13 : vector<16x8xf32> to vector<16x8xbf16>
      %15 = arith.extf %14 : vector<16x8xbf16> to vector<16x8xf32>
      %16 = tpu.transpose %15, [1, 0] : vector<16x8xf32> -> vector<8x16xf32>
      %17 = tpu.iota {dimensions = array<i32: 0>} : vector<8x1xi32>
      %c6_i32 = arith.constant 6 : i32
      %18 = vector.broadcast %c6_i32 : i32 to vector<8x1xi32>
      %19 = arith.cmpi slt, %17, %18 : vector<8x1xi32>
      %cst_12 = arith.constant 0xFF800000 : f32
      %20 = vector.shape_cast %19 : vector<8x1xi1> to vector<8x1xi1>
      %21 = vector.broadcast %20 : vector<8x1xi1> to vector<8x16xi1>
      %22 = vector.broadcast %cst_12 : f32 to vector<8x16xf32>
      %23 = arith.select %21, %16, %22 : vector<8x16xi1>, vector<8x16xf32>
      %cst_13 = arith.constant dense<0xFF800000> : vector<16xf32>
      %24 = vector.multi_reduction <maximumf>, %23, %cst_13 [0] : vector<8x16xf32> to vector<16xf32>
      %25 = vector.shape_cast %24 : vector<16xf32> to vector<1x16xf32>
      %cst_14 = arith.constant 0xFF800000 : f32
      %26 = vector.shape_cast %19 : vector<8x1xi1> to vector<8x1xi1>
      %27 = vector.broadcast %26 : vector<8x1xi1> to vector<8x16xi1>
      %28 = vector.broadcast %cst_14 : f32 to vector<8x16xf32>
      %29 = arith.select %27, %28, %16 : vector<8x16xi1>, vector<8x16xf32>
      %cst_15 = arith.constant dense<0xFF800000> : vector<16xf32>
      %30 = vector.multi_reduction <maximumf>, %29, %cst_15 [0] : vector<8x16xf32> to vector<16xf32>
      %31 = vector.shape_cast %30 : vector<16xf32> to vector<1x16xf32>
      %32 = vector.shape_cast %19 : vector<8x1xi1> to vector<8x1xi1>
      %33 = vector.broadcast %32 : vector<8x1xi1> to vector<8x16xi1>
      %34 = vector.shape_cast %25 : vector<1x16xf32> to vector<1x16xf32>
      %35 = vector.broadcast %34 : vector<1x16xf32> to vector<8x16xf32>
      %36 = vector.shape_cast %31 : vector<1x16xf32> to vector<1x16xf32>
      %37 = vector.broadcast %36 : vector<1x16xf32> to vector<8x16xf32>
      %38 = arith.select %33, %35, %37 : vector<8x16xi1>, vector<8x16xf32>
      %39 = arith.subf %16, %38 : vector<8x16xf32>
      %40 = math.exp %39 : vector<8x16xf32>
      %cst_16 = arith.constant dense<0.000000e+00> : vector<16xf32>
      %41 = vector.multi_reduction <add>, %40, %cst_16 [0] : vector<8x16xf32> to vector<16xf32>
      %42 = vector.shape_cast %41 : vector<16xf32> to vector<1x16xf32>
      %cst_17 = arith.constant 0.000000e+00 : f32
      %43 = vector.shape_cast %19 : vector<8x1xi1> to vector<8x1xi1>
      %44 = vector.broadcast %43 : vector<8x1xi1> to vector<8x16xi1>
      %45 = vector.broadcast %cst_17 : f32 to vector<8x16xf32>
      %46 = arith.select %44, %40, %45 : vector<8x16xi1>, vector<8x16xf32>
      %cst_18 = arith.constant dense<0.000000e+00> : vector<16xf32>
      %47 = vector.multi_reduction <add>, %46, %cst_18 [0] : vector<8x16xf32> to vector<16xf32>
      %48 = vector.shape_cast %47 : vector<16xf32> to vector<1x16xf32>
      %49 = arith.subf %42, %48 : vector<1x16xf32>
      %cst_19 = arith.constant 1.000000e+00 : f32
      %50 = vector.broadcast %cst_19 : f32 to vector<1x16xf32>
      %51 = arith.divf %50, %48 : vector<1x16xf32>
      %cst_20 = arith.constant 1.000000e+00 : f32
      %52 = vector.broadcast %cst_20 : f32 to vector<1x16xf32>
      %53 = arith.divf %52, %49 : vector<1x16xf32>
      %54 = vector.shape_cast %19 : vector<8x1xi1> to vector<8x1xi1>
      %55 = vector.broadcast %54 : vector<8x1xi1> to vector<8x16xi1>
      %56 = vector.shape_cast %51 : vector<1x16xf32> to vector<1x16xf32>
      %57 = vector.broadcast %56 : vector<1x16xf32> to vector<8x16xf32>
      %58 = vector.shape_cast %53 : vector<1x16xf32> to vector<1x16xf32>
      %59 = vector.broadcast %58 : vector<1x16xf32> to vector<8x16xf32>
      %60 = arith.select %55, %57, %59 : vector<8x16xi1>, vector<8x16xf32>
      %61 = arith.mulf %40, %60 : vector<8x16xf32>
      %62 = arith.sitofp %17 : vector<8x1xi32> to vector<8x1xf32>
      %c0_21 = arith.constant 0 : index
      %c0_22 = arith.constant 0 : index
      %63 = vector.load %arg4[%c0_21, %c0_22] : memref<8x1xf32, #tpu.memory_space<vmem>>, vector<8x1xf32>
      %64 = vector.broadcast %63 : vector<8x1xf32> to vector<8x16xf32>
      %65 = arith.addf %61, %64 : vector<8x16xf32>
      %cst_23 = arith.constant 0xFF800000 : f32
      %66 = vector.shape_cast %19 : vector<8x1xi1> to vector<8x1xi1>
      %67 = vector.broadcast %66 : vector<8x1xi1> to vector<8x16xi1>
      %68 = vector.broadcast %cst_23 : f32 to vector<8x16xf32>
      %69 = arith.select %67, %65, %68 : vector<8x16xi1>, vector<8x16xf32>
      %cst_24 = arith.constant dense<0xFF800000> : vector<16xf32>
      %70 = vector.multi_reduction <maximumf>, %69, %cst_24 [0] : vector<8x16xf32> to vector<16xf32>
      %71 = vector.shape_cast %70 : vector<16xf32> to vector<1x16xf32>
      %72 = vector.broadcast %71 : vector<1x16xf32> to vector<8x16xf32>
      %73 = arith.cmpf oeq, %69, %72 : vector<8x16xf32>
      %cst_25 = arith.constant 8.000000e+00 : f32
      %74 = vector.shape_cast %62 : vector<8x1xf32> to vector<8x1xf32>
      %75 = vector.broadcast %74 : vector<8x1xf32> to vector<8x16xf32>
      %76 = vector.broadcast %cst_25 : f32 to vector<8x16xf32>
      %77 = arith.select %73, %75, %76 : vector<8x16xi1>, vector<8x16xf32>
      %cst_26 = arith.constant dense<0x7F800000> : vector<16xf32>
      %78 = vector.multi_reduction <minimumf>, %77, %cst_26 [0] : vector<8x16xf32> to vector<16xf32>
      %79 = vector.shape_cast %78 : vector<16xf32> to vector<1x16xf32>
      %80 = vector.broadcast %62 : vector<8x1xf32> to vector<8x16xf32>
      %81 = vector.broadcast %79 : vector<1x16xf32> to vector<8x16xf32>
      %82 = arith.cmpf oeq, %80, %81 : vector<8x16xf32>
      %cst_27 = arith.constant 0xFF800000 : f32
      %83 = vector.broadcast %cst_27 : f32 to vector<8x16xf32>
      %84 = arith.select %82, %83, %69 : vector<8x16xi1>, vector<8x16xf32>
      %cst_28 = arith.constant dense<0xFF800000> : vector<16xf32>
      %85 = vector.multi_reduction <maximumf>, %84, %cst_28 [0] : vector<8x16xf32> to vector<16xf32>
      %86 = vector.shape_cast %85 : vector<16xf32> to vector<1x16xf32>
      %87 = vector.broadcast %86 : vector<1x16xf32> to vector<8x16xf32>
      %88 = arith.cmpf oeq, %84, %87 : vector<8x16xf32>
      %cst_29 = arith.constant 8.000000e+00 : f32
      %89 = vector.shape_cast %62 : vector<8x1xf32> to vector<8x1xf32>
      %90 = vector.broadcast %89 : vector<8x1xf32> to vector<8x16xf32>
      %91 = vector.broadcast %cst_29 : f32 to vector<8x16xf32>
      %92 = arith.select %88, %90, %91 : vector<8x16xi1>, vector<8x16xf32>
      %cst_30 = arith.constant dense<0x7F800000> : vector<16xf32>
      %93 = vector.multi_reduction <minimumf>, %92, %cst_30 [0] : vector<8x16xf32> to vector<16xf32>
      %94 = vector.shape_cast %93 : vector<16xf32> to vector<1x16xf32>
      %95 = vector.broadcast %62 : vector<8x1xf32> to vector<8x16xf32>
      %96 = vector.broadcast %94 : vector<1x16xf32> to vector<8x16xf32>
      %97 = arith.cmpf oeq, %95, %96 : vector<8x16xf32>
      %cst_31 = arith.constant 0xFF800000 : f32
      %98 = vector.broadcast %cst_31 : f32 to vector<8x16xf32>
      %99 = arith.select %97, %98, %84 : vector<8x16xi1>, vector<8x16xf32>
      %cst_32 = arith.constant 0xFF800000 : f32
      %100 = vector.broadcast %cst_32 : f32 to vector<8x16xf32>
      %101 = arith.cmpf oeq, %99, %100 : vector<8x16xf32>
      %102 = vector.broadcast %19 : vector<8x1xi1> to vector<8x16xi1>
      %103 = arith.andi %102, %101 : vector<8x16xi1>
      %cst_33 = arith.constant 0.000000e+00 : f32
      %104 = vector.broadcast %cst_33 : f32 to vector<8x16xf32>
      %105 = arith.select %103, %61, %104 : vector<8x16xi1>, vector<8x16xf32>
      %cst_34 = arith.constant dense<0.000000e+00> : vector<16xf32>
      %106 = vector.multi_reduction <add>, %105, %cst_34 [0] : vector<8x16xf32> to vector<16xf32>
      %107 = vector.shape_cast %106 : vector<16xf32> to vector<1x16xf32>
      %cst_35 = arith.constant 1.000000e+00 : f32
      %108 = vector.broadcast %cst_35 : f32 to vector<1x16xf32>
      %109 = arith.divf %108, %107 : vector<1x16xf32>
      %cst_36 = arith.constant 0.000000e+00 : f32
      %110 = vector.shape_cast %19 : vector<8x1xi1> to vector<8x1xi1>
      %111 = vector.broadcast %110 : vector<8x1xi1> to vector<8x16xi1>
      %112 = vector.broadcast %cst_36 : f32 to vector<8x16xf32>
      %113 = arith.select %111, %112, %61 : vector<8x16xi1>, vector<8x16xf32>
      %cst_37 = arith.constant dense<0.000000e+00> : vector<16xf32>
      %114 = vector.multi_reduction <add>, %113, %cst_37 [0] : vector<8x16xf32> to vector<16xf32>
      %115 = vector.shape_cast %114 : vector<16xf32> to vector<1x16xf32>
      %cst_38 = arith.constant 1.000000e+00 : f32
      %116 = vector.broadcast %cst_38 : f32 to vector<1x16xf32>
      %117 = arith.divf %116, %115 : vector<1x16xf32>
      %cst_39 = arith.constant dense<true> : vector<8x1xi1>
      %118 = arith.xori %19, %cst_39 : vector<8x1xi1>
      %119 = vector.broadcast %118 : vector<8x1xi1> to vector<8x16xi1>
      %120 = arith.ori %103, %119 : vector<8x16xi1>
      %121 = vector.shape_cast %19 : vector<8x1xi1> to vector<8x1xi1>
      %122 = vector.broadcast %121 : vector<8x1xi1> to vector<8x16xi1>
      %123 = vector.shape_cast %109 : vector<1x16xf32> to vector<1x16xf32>
      %124 = vector.broadcast %123 : vector<1x16xf32> to vector<8x16xf32>
      %125 = vector.shape_cast %117 : vector<1x16xf32> to vector<1x16xf32>
      %126 = vector.broadcast %125 : vector<1x16xf32> to vector<8x16xf32>
      %127 = arith.select %122, %124, %126 : vector<8x16xi1>, vector<8x16xf32>
      %128 = arith.mulf %61, %127 : vector<8x16xf32>
      %cst_40 = arith.constant 0.000000e+00 : f32
      %129 = vector.broadcast %cst_40 : f32 to vector<8x16xf32>
      %130 = arith.select %120, %128, %129 : vector<8x16xi1>, vector<8x16xf32>
      %c0_41 = arith.constant 0 : index
      %c0_42 = arith.constant 0 : index
      %131 = vector.load %arg5[%c0_41, %c0_42] : memref<8x16xf32, #tpu.memory_space<vmem>>, vector<8x16xf32>
      tpu.vector_store %arg5[%c0_41, %c0_42], %130 {strides = array<i32>} : memref<8x16xf32, #tpu.memory_space<vmem>>, vector<8x16xf32>,
      %132 = arith.extui %120 : vector<8x16xi1> to vector<8x16xi32>
      %c0_43 = arith.constant 0 : index
      %c0_44 = arith.constant 0 : index
      %133 = vector.load %arg6[%c0_43, %c0_44] : memref<8x16xi32, #tpu.memory_space<vmem>>, vector<8x16xi32>
      tpu.vector_store %arg6[%c0_43, %c0_44], %132 {strides = array<i32>} : memref<8x16xi32, #tpu.memory_space<vmem>>, vector<8x16xi32>,
    } else {
    }
    return
  }
  func.func @transform_0(%arg0: i32, %arg1: i32) -> (i32, i32) {
    %c0_i32 = arith.constant 0 : i32
    return %arg0, %arg1 : i32, i32
  }
  func.func @transform_1(%arg0: i32, %arg1: i32) -> (i32, i32) {
    %c0_i32 = arith.constant 0 : i32
    %c0_i32_0 = arith.constant 0 : i32
    return %arg1, %c0_i32 : i32, i32
  }
  func.func @transform_2(%arg0: i32, %arg1: i32) -> (i32, i32) {
    %c0_i32 = arith.constant 0 : i32
    %c0_i32_0 = arith.constant 0 : i32
    %c0_i32_1 = arith.constant 0 : i32
    return %c0_i32, %c0_i32_0 : i32, i32
  }
  func.func @transform_3(%arg0: i32, %arg1: i32) -> (i32, i32) {
    %c0_i32 = arith.constant 0 : i32
    %c0_i32_0 = arith.constant 0 : i32
    return %c0_i32, %arg0 : i32, i32
  }
  func.func @transform_4(%arg0: i32, %arg1: i32) -> (i32, i32) {
    %c0_i32 = arith.constant 0 : i32
    %c0_i32_0 = arith.constant 0 : i32
    return %c0_i32, %arg0 : i32, i32
  }
}

</mosaic_0001>

<bundles_post_ra>
// kernel: tpu_custom_call.1
= control target key start
LH: loop header
LB: loop body
LE: loop exit
PB: predicated region body
PF: predicated region fallthrough
CT: control target
= control target key end

     0   :  { %10 = vsyncpa [#allocation4], 0  ;;  %v372_v1 = vmov 0.0   ;;  %vm373_vm0 = vmmov 0   ;;  %vm23_vm1 = vcmask 64512   ;;  %s515_s0 = inlined_call_operand.vmem [shape: f32[16,32], index: 0, kind: input, shape index: {}]   ;;  %s516_s1 = inlined_call_operand.vmem [shape: bf16[32,8], index: 1, kind: input, shape index: {}]   ;;  %s517_s2 = inlined_call_operand.vmem [shape: f32[8,1], index: 2, kind: input, shape index: {}]   ;;  %s518_s3 = inlined_call_operand.hbm [shape: f32[8,16], index: 3, kind: output, shape index: {0}]   ;;  %s519_s4 = inlined_call_operand.hbm [shape: s32[8,16], index: 4, kind: output, shape index: {1}]  }
   0x1   :  { %v312_v0 = vld [vmem:[%s516_s1] sm:$0xff]   ;;  %296 = vmatprep.subr.bf16.mxu0 %v372_v1  ;;  %v313_v2 = vld [vmem:[%s516_s1 + $0x8] sm:$0xff]   ;;  %300 = vmatprep.mubr.msk.bf16.mxu0 %vm373_vm0, %v372_v1 }
   0x2   :  { %297 = vmatpush3.bf16.msra.mxu0 %v312_v0  ;;  %v26_v3 = vld [vmem:[%s515_s0] sm:$0xff]  ;;  %v27_v4 = vld [vmem:[%s515_s0 + $0x8] sm:$0xff] }
   0x3   :  { %11 = vsyncpa [#allocation6], 0  ;;  %298 = vmatprep.subr.bf16.mxu0 %v372_v1  ;;  %24 = vst.msk [vmem:[#allocation2] sm:$0xff] %vm23_vm1, %v372_v1  ;;  %v28_v5 = vpack.c.bf16 %v27_v4, %v26_v3  ;;  %vm47_vm2 = vcmask 261120   ;;  %v186_v6 = vld [vmem:[%s517_s2] sm:$0xff]  ;;  %v374_v7 = vmov 0   ;;  %v137_v21 = vlaneseq }
   0x4   :  { %25 = vst.msk [vmem:[#allocation2 + $0x8] sm:$0xff] %vm23_vm1, %v372_v1  ;;  %310 = vset.pattern.permute.xlu1 %v374_v7  ;;  %vm143_vm4 = vcmask 130048   ;;  %vm375_vm9 = vmmov 1   ;;  %s376_s0 = smov [#allocation5]  }
   0x5   :  { %189 = vperm.xlu1 %310, %v186_v6   ;;  %v424_v22 = vshrl.u32 %v137_v21, 7  ;;  %s278_s2 = sshll.u32 %s376_s0, 4  ;;  %s279_s2 = int_to_ptr.vmem [resolvable:$true] %s278_s2 }
   0x6   :  { %299 = vmatpush3.bf16.msra.mxu0 %v313_v2  ;;  %s324_s24 = scalar_lea.vmem %s279_s2, 128  ;;  %p329_p1 = scmp.lt.s32.totalorder %s279_s2, %s279_s2 }
   0x7   :  { %vm139_vm3 = vcmp.lt.s32.totalorder %v424_v22, 6  ;;  %p325_p0 = scmp.ne.s32.totalorder %s279_s2, %s324_s24  ;;  %p330_p2 = scmp.lt.s32.totalorder %s324_s24, %s324_s24 }
   0x8   :  { %vm457_vm10 = vmxor %vm139_vm3, %vm375_vm9 }
   0x9   :  { %301 = vmatmul.mubr.msk.bf16.vlgmr.msra.gmra.mrb[0].mxu0 %vm47_vm2, %v28_v5  ;;  %p331_p3 = por %p330_p2, %p329_p1 }
   0xa   :  { %v29_v8 = vld [vmem:[#allocation2] sm:$0xff] }
   0xb   :  { %v30_v10 = vld [vmem:[#allocation2 + $0x8] sm:$0xff]  ;;  %p332_p4 = pnand %p331_p3, %p325_p0 }
  0x84   :  { %v190_v62 = vpop.permute.xlu1 %189 }
  0xdc   :  { %v85_v9 = vpop.f32.mrb[0].mxu0 }
  0xdd   :  { %v92_v11 = vadd.f32 %v85_v9, %v29_v8  ;;  %v302_v12 = vpop.f32.mrb[1].mxu0 }
  0xde   :  { %v88_v13 = vpop.f32.mrb[2].mxu0 }
  0xdf   :  { %95 = vst.msk [vmem:[#allocation2] sm:$0xff] %vm23_vm1, %v92_v11  ;;  %v93_v14 = vadd.f32 %v88_v13, %v30_v10  ;;  %v303_v15 = vpop.f32.mrb[3].mxu0  ;;  %v185_v10 = vcvt.s32.f32 %v424_v22 }
  0xe1   :  { %96 = vst.msk [vmem:[#allocation2 + $0x8] sm:$0xff] %vm23_vm1, %v93_v14 }
  0xe6   :  { %v100_v16 = vld [vmem:[#allocation2] sm:$0xff] }
  0xe8   :  { %v101_v17 = vld [vmem:[#allocation2 + $0x8] sm:$0xff] }
  0xe9   :  { %v102_v18 = vpack.c.bf16 %v101_v17, %v100_v16 }
  0xeb   :  { %v103_v19 = vunpack.c.l.bf16 %v102_v18  ;;  %v104_v20 = vunpack.c.h.bf16 %v102_v18 }
  0xed   :  { %105 = vxpose.xlu0.b32.start [1/2] (short) (narrow) %v103_v19, 8 }
  0xf1   :  { %106 = vxpose.xlu0.b32.end [2/2] (short) (narrow) %v104_v20, 8 }
 0x11a   :  { %311 = vset.pattern.permute.xlu0 %v374_v7 }
 0x16d   :  { %v121_v23 = vpop.trf.xlu0 }
 0x16e   :  { %v142_v24 = vsel %vm139_vm3, %v121_v23, -inf  ;;  %v151_v25 = vsel %vm139_vm3, -inf, %v121_v23 }
 0x16f   :  { %v144_v26 = vsel %vm143_vm4, %v142_v24, -inf  ;;  %v152_v27 = vsel %vm143_vm4, %v151_v25, -inf }
 0x170   :  { %v145_v28 = vrot.slane %v144_v26, 4  ;;  %v153_v29 = vrot.slane %v152_v27, 4 }
 0x172   :  { %v146_v30 = vmax.f32 %v144_v26, %v145_v28  ;;  %v154_v31 = vmax.f32 %v152_v27, %v153_v29 }
 0x174   :  { %v147_v32 = vrot.slane %v146_v30, 2  ;;  %v155_v33 = vrot.slane %v154_v31, 2 }
 0x176   :  { %v148_v34 = vmax.f32 %v146_v30, %v147_v32  ;;  %v156_v35 = vmax.f32 %v154_v31, %v155_v33 }
 0x178   :  { %v149_v36 = vrot.slane %v148_v34, 1  ;;  %v157_v37 = vrot.slane %v156_v35, 1 }
 0x17a   :  { %v150_v38 = vmax.f32 %v148_v34, %v149_v36  ;;  %v158_v39 = vmax.f32 %v156_v35, %v157_v37 }
 0x17c   :  { %v159_v40 = vsel %vm139_vm3, %v150_v38, %v158_v39 }
 0x17d   :  { %v160_v41 = vsub.f32 %v121_v23, %v159_v40 }
 0x17f   :  { %v161_v42 = vmul.f32 1.442695, %v160_v41 }
 0x181   :  { %314 = vpow2.f32 %v161_v42 }
 0x18b   :  { %v315_v43 = vpop.eup %314 }
 0x18c   :  { %v163_v44 = vsel %vm143_vm4, %v315_v43, 0.0  ;;  %v170_v45 = vsel %vm139_vm3, %v315_v43, 0.0 }
 0x18d   :  { %v164_v46 = vrot.slane %v163_v44, 4  ;;  %v171_v47 = vsel %vm143_vm4, %v170_v45, 0.0 }
 0x18e   :  { %v172_v48 = vrot.slane %v171_v47, 4 }
 0x18f   :  { %v165_v49 = vadd.f32 %v164_v46, %v163_v44 }
 0x190   :  { %v173_v50 = vadd.f32 %v172_v48, %v171_v47 }
 0x191   :  { %v166_v51 = vrot.slane %v165_v49, 2 }
 0x192   :  { %v174_v52 = vrot.slane %v173_v50, 2 }
 0x193   :  { %v167_v53 = vadd.f32 %v166_v51, %v165_v49 }
 0x194   :  { %v175_v54 = vadd.f32 %v174_v52, %v173_v50 }
 0x195   :  { %v168_v55 = vrot.slane %v167_v53, 1 }
 0x196   :  { %v176_v56 = vrot.slane %v175_v54, 1 }
 0x197   :  { %v169_v57 = vadd.f32 %v168_v55, %v167_v53 }
 0x198   :  { %v177_v58 = vadd.f32 %v176_v56, %v175_v54 }
 0x19a   :  { %v178_v59 = vsub.f32 %v169_v57, %v177_v58  ;;  %316 = vrcp.f32 %v177_v58 }
 0x19c   :  { %318 = vrcp.f32 %v178_v59 }
 0x1a4   :  { %v317_v60 = vpop.eup %316 }
 0x1a6   :  { %v319_v61 = vpop.eup %318 }
 0x1a7   :  { %v183_v63 = vsel %vm139_vm3, %v317_v60, %v319_v61 }
 0x1a8   :  { %v441_v0 = vmul.f32 %v315_v43, %v183_v63 }
 0x1aa   :  { %v192_v1 = vadd.f32 %v190_v62, %v441_v0  ;;  %v242_v31 = vsel %vm139_vm3, 0.0, %v441_v0 }
 0x1ab   :  { %v243_v34 = vsel %vm143_vm4, %v242_v31, 0.0 }
 0x1ac   :  { %v193_v2 = vsel %vm139_vm3, %v192_v1, -inf  ;;  %v244_v36 = vrot.slane %v243_v34, 4 }
 0x1ad   :  { %v194_v3 = vsel %vm143_vm4, %v193_v2, -inf }
 0x1ae   :  { %v195_v4 = vrot.slane %v194_v3, 4  ;;  %v245_v39 = vadd.f32 %v244_v36, %v243_v34 }
 0x1b0   :  { %v196_v5 = vmax.f32 %v194_v3, %v195_v4  ;;  %v246_v41 = vrot.slane %v245_v39, 2 }
 0x1b2   :  { %v197_v6 = vrot.slane %v196_v5, 2  ;;  %v247_v46 = vadd.f32 %v246_v41, %v245_v39 }
 0x1b4   :  { %v198_v8 = vmax.f32 %v196_v5, %v197_v6 }
 0x1b6   :  { %v199_v9 = vrot.slane %v198_v8, 1 }
 0x1b8   :  { %v200_v11 = vmax.f32 %v198_v8, %v199_v9 }
 0x1ba   :  { %vm201_vm5 = vcmp.eq.f32.partialorder %v193_v2, %v200_v11 }
 0x1bb   :  { %v202_v12 = vsel %vm201_vm5, %v185_v10, 8.0 }
 0x1bc   :  { %v203_v13 = vsel %vm143_vm4, %v202_v12, inf }
 0x1bd   :  { %v204_v14 = vrot.slane %v203_v13, 4 }
 0x1bf   :  { %v205_v15 = vmin.f32 %v203_v13, %v204_v14 }
 0x1c1   :  { %v206_v16 = vrot.slane %v205_v15, 2 }
 0x1c3   :  { %v207_v17 = vmin.f32 %v205_v15, %v206_v16 }
 0x1c5   :  { %v208_v18 = vrot.slane %v207_v17, 1 }
 0x1c7   :  { %v209_v19 = vmin.f32 %v207_v17, %v208_v18 }
 0x1c9   :  { %vm210_vm6 = vcmp.eq.f32.partialorder %v185_v10, %v209_v19 }
 0x1ca   :  { %v211_v20 = vsel %vm210_vm6, -inf, %v193_v2 }
 0x1cb   :  { %v212_v21 = vsel %vm143_vm4, %v211_v20, -inf }
 0x1cc   :  { %v213_v23 = vrot.slane %v212_v21, 4 }
 0x1ce   :  { %v214_v24 = vmax.f32 %v212_v21, %v213_v23 }
 0x1d0   :  { %v215_v25 = vrot.slane %v214_v24, 2 }
 0x1d2   :  { %v216_v26 = vmax.f32 %v214_v24, %v215_v25 }
 0x1d4   :  { %v217_v27 = vrot.slane %v216_v26, 1 }
 0x1d6   :  { %v218_v28 = vmax.f32 %v216_v26, %v217_v27 }
 0x1d8   :  { %vm219_vm7 = vcmp.eq.f32.partialorder %v211_v20, %v218_v28 }
 0x1d9   :  { %v220_v29 = vsel %vm219_vm7, %v185_v10, 8.0 }
 0x1da   :  { %v221_v30 = vsel %vm143_vm4, %v220_v29, inf }
 0x1db   :  { %v222_v32 = vrot.slane %v221_v30, 4 }
 0x1dd   :  { %v223_v33 = vmin.f32 %v221_v30, %v222_v32 }
 0x1df   :  { %v224_v35 = vrot.slane %v223_v33, 2 }
 0x1e1   :  { %v225_v37 = vmin.f32 %v223_v33, %v224_v35 }
 0x1e3   :  { %v226_v38 = vrot.slane %v225_v37, 1 }
 0x1e5   :  { %v227_v40 = vmin.f32 %v225_v37, %v226_v38 }
 0x1e7   :  { %vm228_vm8 = vcmp.eq.f32.partialorder %v185_v10, %v227_v40 }
 0x1e8   :  { %v229_v42 = vsel %vm228_vm8, -inf, %v211_v20 }
 0x1e9   :  { %vm230_vm11 = vcmp.eq.f32.partialorder %v229_v42, -inf }
 0x1ea   :  { %vm463_vm12 = vmand %vm139_vm3, %vm230_vm11 }
 0x1eb   :  { %v232_v45 = vsel %vm463_vm12, %v441_v0, 0.0  ;;  %vm255_vm13 = vmor %vm463_vm12, %vm457_vm10 }
 0x1ec   :  { %v233_v47 = vsel %vm143_vm4, %v232_v45, 0.0  ;;  %v260_v48 = vsel %vm255_vm13, 1, %v374_v7 }
 0x1ed   :  { %v234_v49 = vrot.slane %v233_v47, 4  ;;  %261 = vst.msk [vmem:[#allocation5] sm:$0xff] %vm143_vm4, %v260_v48 }
 0x1ee   :  { %335 = shalt.err (!%p332_p4)
}
 0x1ef   :  { %s336_s27 = scalar_lea.hbm %s519_s4, 128 }
 0x1f0   :  { %p337_p5 = scmp.ne.s32.totalorder %s519_s4, %s336_s27  ;;  %p340_p6 = scmp.lt.u32.totalorder %s336_s27, %s519_s4 }
 0x1f2   :  { %p342_p7 = pnand %p340_p6, %p337_p5 }
 0x1f4   :  { %345 = shalt.err (!%p342_p7)
}
 0x1f5   :  { %281 = dma.vmem_to_hbm [thread:$0]  %s279_s2, 128, %s519_s4, [#allocation6]   ;;  %v235_v7 = vadd.f32 %v234_v49, %v233_v47  ;;  %v248_v50 = vrot.slane %v247_v46, 1 }
 0x1f6   :  { %s377_s8 = smov [#allocation3]  }
 0x1f7   :  { %v236_v51 = vrot.slane %v235_v7, 2  ;;  %v249_v53 = vadd.f32 %v248_v50, %v247_v46  ;;  %s268_s9 = sshll.u32 %s377_s8, 4  ;;  %s269_s9 = int_to_ptr.vmem [resolvable:$true] %s268_s9 }
 0x1f8   :  { %s346_s4 = scalar_lea.vmem %s269_s9, 128  ;;  %p351_p9 = scmp.lt.s32.totalorder %s269_s9, %s269_s9 }
 0x1f9   :  { %v237_v52 = vadd.f32 %v236_v51, %v235_v7  ;;  %320 = vrcp.f32 %v249_v53  ;;  %p347_p8 = scmp.ne.s32.totalorder %s269_s9, %s346_s4  ;;  %p352_p10 = scmp.lt.s32.totalorder %s346_s4, %s346_s4 }
 0x1fb   :  { %v238_v54 = vrot.slane %v237_v52, 1  ;;  %p353_p11 = por %p352_p10, %p351_p9 }
 0x1fd   :  { %v239_v55 = vadd.f32 %v238_v54, %v237_v52  ;;  %p354_p12 = pnand %p353_p11, %p347_p8 }
 0x1ff   :  { %322 = vrcp.f32 %v239_v55 }
 0x203   :  { %v321_v56 = vpop.eup %320 }
 0x209   :  { %v323_v57 = vpop.eup %322 }
 0x20a   :  { %v256_v58 = vsel %vm139_vm3, %v323_v57, %v321_v56 }
 0x20b   :  { %v257_v59 = vmul.f32 %v256_v58, %v441_v0 }
 0x20d   :  { %v258_v60 = vsel %vm255_vm13, %v257_v59, 0.0 }
 0x20e   :  { %259 = vst.msk [vmem:[#allocation3] sm:$0xff] %vm143_vm4, %v258_v60 }
 0x20f   :  { %357 = shalt.err (!%p354_p12)
}
 0x210   :  { %s358_s12 = scalar_lea.hbm %s518_s3, 128 }
 0x211   :  { %p359_p13 = scmp.ne.s32.totalorder %s518_s3, %s358_s12  ;;  %p362_p0 = scmp.lt.u32.totalorder %s358_s12, %s518_s3 }
 0x213   :  { %p364_p1 = pnand %p362_p0, %p359_p13 }
 0x215   :  { %367 = shalt.err (!%p364_p1)
}
 0x216   :  { %271 = dma.vmem_to_hbm [thread:$0]  %s269_s9, 128, %s518_s3, [#allocation4]  }
 0x217   :  { %368 = dma.done.wait [#allocation4], 128  }
 0x218   :  { %369 = vsyncadd [#allocation4], 4294967168 }
 0x219   :  { %370 = dma.done.wait [#allocation6], 128  }
 0x21a   :  { %371 = vsyncadd [#allocation6], 4294967168 }
 0x21b   :  { %288 = vsyncpa [#allocation4], 1 }
 0x21c   :  { %289 = vsyncpa [#allocation6], 1 }

</bundles_post_ra>
